<compile_context>
chip_gen: v7x
topology: tpu7x:2x2x1
jax: 0.10.0
libtpu: 0.0.40
codegen_flags: <defaults>
</compile_context>

<pallas_src>
import jax
import jax.numpy as jnp
from jax.experimental import pallas as pl
from jax.experimental.pallas import tpu as pltpu


def _round_up(x, m):
    return ((x + m - 1) // m) * m


def _device_defaults():
    """Per-generation tile / VMEM / core-sharding defaults."""
    try:
        kind = jax.devices()[0].device_kind.lower()
    except Exception:  # pragma: no cover - CPU interpret fallback
        kind = ""
    if "v7" in kind:
        # 64 MiB VMEM, 2 TensorCores: smaller tile, shard g across the cores.
        return {"max_block_b": 1024, "vmem_cap": 48 << 20, "g_sem": pltpu.CORE_PARALLEL}
    if "v6" in kind:
        # 128 MiB VMEM: big batch tile to amortize the ~0.35 us/step overhead.
        return {"max_block_b": 2048, "vmem_cap": 100 << 20, "g_sem": "parallel"}
    # v5e and anything else: conservative (16 MiB scoped default, compute-bound).
    return {"max_block_b": 512, "vmem_cap": 64 << 20, "g_sem": "parallel"}


def _mlp_kernel(x_ref, w12_ref, b12_ref, w3_ref, b3_ref, o_ref):
    """Pre-folded MLP: relu(x @ W12 + b12) @ W3 + b3 (torch MLP, eval mode)."""
    x = x_ref[...].astype(w12_ref.dtype)                       # bf16 operands for MXU
    h = jnp.dot(x, w12_ref[...], preferred_element_type=jnp.float32)
    h = h + b12_ref[...].astype(jnp.float32)                   # bias add in f32 (VPU)
    # TODO(synk): training-mode dropout (stochastic masking) not reproduced.
    h = jnp.maximum(h, 0.0)                                    # ReLU in f32
    o = jnp.dot(h.astype(w3_ref.dtype), w3_ref[...],
                preferred_element_type=jnp.float32)
    o = o + b3_ref[...].astype(jnp.float32)
    o_ref[...] = o.astype(o_ref.dtype)


def clip_align_forward(x_stacked, fused_params, *, max_block_b=None):
    """Run both (en, zh) transforms in one pallas_call.

    x_stacked:    (2, B, D_in) f32 -- [en; zh] stacked on a leading axis.
    fused_params: (W12, b12, W3p, b3p), each with a leading axis of size 2.
    Returns (2, B, D_out_padded) f32.
    """
    w12, b12, w3, b3 = fused_params
    G, B, D_in = x_stacked.shape
    H = w12.shape[-1]
    Dp = w3.shape[-1]  # lane-dense (multiple of 128) padded output width

    cfg = _device_defaults()
    if max_block_b is None:
        max_block_b = cfg["max_block_b"]

    # Batch tile: 8-row aligned, no wrapper-side padding.  Pallas handles the
    # ragged last block (reads masked/garbage rows, tail writes discarded);
    # the wrapper slice keeps only the first B rows anyway.
    block_b = min(max_block_b, _round_up(B, 8))

    # Grid order matters: g OUTER, batch INNER.  The (g, 0, 0) weight index_maps
    # only keep W12/W3 resident across batch tiles because batch is innermost;
    # swapping axes would re-DMA the weights on every batch tile.
    grid = (G, pl.cdiv(B, block_b))

    # Advisory cost for XLA's scheduler around the custom call.
    flops = 2 * G * B * (D_in * H + H * Dp)
    bytes_accessed = (G * B * D_in * 4                 # x read (f32)
                      + G * B * Dp * 4                 # out write (f32)
                      + G * (D_in * H + H * Dp) * 2    # bf16 weights
                      + G * (H + Dp) * 4)              # f32 biases

    # Scoped-VMEM need for this tile: x/out double-buffered, weights single-
    # buffered, plus the f32 h intermediate.  Give the compiler headroom.
    vmem_needed = (2 * block_b * D_in * 4
                   + 2 * block_b * Dp * 4
                   + D_in * H * 2 + H * Dp * 2 + (H + Dp) * 4
                   + block_b * H * 4)
    vmem_limit = min(cfg["vmem_cap"],
                     max(32 << 20, int(vmem_needed * 1.5) + (4 << 20)))

    def _weight_spec(shape):
        # Invariant along the inner batch axis -> single buffer is enough;
        # halves the VMEM held by weights with zero pipelining cost.
        return pl.BlockSpec(shape, lambda g, i: (g, 0, 0),
                            pipeline_mode=pl.Buffered(1))

    return pl.pallas_call(
        _mlp_kernel,
        out_shape=jax.ShapeDtypeStruct((G, B, Dp), jnp.float32),
        grid_spec=pl.GridSpec(
            grid=grid,
            in_specs=[
                pl.BlockSpec((pl.Squeezed(), block_b, D_in), lambda g, i: (g, i, 0)),  # x
                _weight_spec((pl.Squeezed(), D_in, H)),                                # W12
                _weight_spec((pl.Squeezed(), 1, H)),                                   # b12
                _weight_spec((pl.Squeezed(), H, Dp)),                                  # W3 (padded)
                _weight_spec((pl.Squeezed(), 1, Dp)),                                  # b3 (padded)
            ],
            out_specs=pl.BlockSpec((pl.Squeezed(), block_b, Dp), lambda g, i: (g, i, 0)),
        ),
        compiler_params=pltpu.CompilerParams(
            # g axis: CORE_PARALLEL on v7x (actually shards en/zh across the two
            # TensorCores), plain "parallel" on single-TC parts.
            dimension_semantics=(cfg["g_sem"], "parallel"),
            vmem_limit_bytes=vmem_limit,
        ),
        cost_estimate=pl.CostEstimate(flops=flops, transcendentals=0,
                                      bytes_accessed=bytes_accessed),
    )(x_stacked, w12, b12, w3, b3)


def init_mlp_params(key, input_dim, hidden_dim, output_dim, dtype=jnp.float32):
    """Raw MLP(num_layers=1) params in (in, out) layout, PyTorch-style uniform init."""
    k = jax.random.split(key, 6)
    s_in = 1.0 / jnp.sqrt(input_dim)
    s_h = 1.0 / jnp.sqrt(hidden_dim)
    w1 = jax.random.uniform(k[0], (input_dim, hidden_dim), dtype, -s_in, s_in)
    b1 = jax.random.uniform(k[1], (1, hidden_dim), dtype, -s_in, s_in)
    w2 = jax.random.uniform(k[2], (hidden_dim, hidden_dim), dtype, -s_h, s_h)
    b2 = jax.random.uniform(k[3], (1, hidden_dim), dtype, -s_h, s_h)
    w3 = jax.random.uniform(k[4], (hidden_dim, output_dim), dtype, -s_h, s_h)
    b3 = jax.random.uniform(k[5], (1, output_dim), dtype, -s_h, s_h)
    return (w1, b1, w2, b2, w3, b3)


def fuse_mlp_params(raw, weight_dtype=jnp.bfloat16, lane_pad=128):
    """Fold W1·W2 / b1·W2+b2 (exact in eval mode: no nonlinearity in between),
    cast weights to bf16 (single rounding of the folded product), and zero-pad
    the output projection to a lane-dense (multiple-of-128) width."""
    w1, b1, w2, b2, w3, b3 = raw
    w12 = (w1 @ w2).astype(weight_dtype)          # (D_in, H)
    b12 = (b1 @ w2 + b2)                          # (1, H), kept f32
    d_out = w3.shape[1]
    dp = _round_up(d_out, lane_pad)
    w3p = jnp.pad(w3, ((0, 0), (0, dp - d_out))).astype(weight_dtype)
    b3p = jnp.pad(b3, ((0, 0), (0, dp - d_out)))  # f32
    return (w12, b12, w3p, b3p)


class CLIPAlignPallas:
    """JAX/Pallas equivalent of the PyTorch CLIPAlign module (num_layers=1, eval)."""

    def __init__(self, key, input_dim=32, hidden_dim=64, output_dim=16,
                 weight_dtype=jnp.bfloat16):
        k_en, k_zh = jax.random.split(key)
        self.output_dim = output_dim
        self.en_raw = init_mlp_params(k_en, input_dim, hidden_dim, output_dim)
        self.zh_raw = init_mlp_params(k_zh, input_dim, hidden_dim, output_dim)
        en_f = fuse_mlp_params(self.en_raw, weight_dtype)
        zh_f = fuse_mlp_params(self.zh_raw, weight_dtype)
        # Stack en/zh params along a leading axis of size 2 -> one pallas_call.
        self.fused = tuple(jnp.stack([e, z]) for e, z in zip(en_f, zh_f))

    def __call__(self, en_embeddings, zh_embeddings):
        B = en_embeddings.shape[0]
        x = jnp.stack([en_embeddings, zh_embeddings])     # (2, B, D_in)
        out = clip_align_forward(x, self.fused)           # (2, B, Dp)
        out = out[:, :B, :self.output_dim]
        return out[0], out[1]


def _mlp_ref_module(x, raw):
    """Full-f32 reference matching the original PyTorch module math (eval mode)."""
    w1, b1, w2, b2, w3, b3 = raw
    h = x @ w1 + b1
    h = jnp.maximum(h @ w2 + b2, 0.0)
    return h @ w3 + b3


def _mlp_ref_fused(x, fused, d_out):
    """Pure-JAX reference mirroring the exact kernel math (bf16 weights, f32 accum)."""
    w12, b12, w3, b3 = fused
    h = jnp.dot(x.astype(w12.dtype), w12, preferred_element_type=jnp.float32)
    h = jnp.maximum(h + b12.astype(jnp.float32), 0.0)
    o = jnp.dot(h.astype(w3.dtype), w3, preferred_element_type=jnp.float32)
    o = o + b3.astype(jnp.float32)
    return o[:, :d_out]


if __name__ == "__main__":
    key = jax.random.PRNGKey(0)
    k_params, k_en, k_zh = jax.random.split(key, 3)

    # Small shapes: batch=8, input_dim=32, hidden_dim=64, output_dim=16
    B, D_IN, H, D_OUT = 8, 32, 64, 16

    model = CLIPAlignPallas(k_params, input_dim=D_IN, hidden_dim=H, output_dim=D_OUT)

    en = jax.random.normal(k_en, (B, D_IN), jnp.float32)
    zh = jax.random.normal(k_zh, (B, D_IN), jnp.float32)

    en_out, zh_out = model(en, zh)
    jax.block_until_ready((en_out, zh_out))

    assert en_out.shape == (B, D_OUT) and zh_out.shape == (B, D_OUT)

    # Tight check vs. a pure-JAX reference mirroring the kernel math exactly.
    en_fused = tuple(p[0] for p in model.fused)
    zh_fused = tuple(p[1] for p in model.fused)
    assert jnp.allclose(en_out, _mlp_ref_fused(en, en_fused, D_OUT), atol=2e-3, rtol=2e-3)
    assert jnp.allclose(zh_out, _mlp_ref_fused(zh, zh_fused, D_OUT), atol=2e-3, rtol=2e-3)

    # Loose check vs. the original unfused f32 module math: differences are only
    # bf16 rounding of the weights/activations (the W1·W2 pre-fold is exact).
    assert jnp.allclose(en_out, _mlp_ref_module(en, model.en_raw), atol=3e-2, rtol=3e-2)
    assert jnp.allclose(zh_out, _mlp_ref_module(zh, model.zh_raw), atol=3e-2, rtol=3e-2)

    print("KERNEL_OK")
</pallas_src>

<mosaic_0001>
module attributes {stable_mosaic.version = 11 : i64} {
  func.func @_mlp_kernel(%arg0: i32, %arg1: i32, %arg2: memref<1x8x32xf32, #tpu.memory_space<vmem>>, %arg3: memref<1x32x64xbf16, #tpu.memory_space<vmem>>, %arg4: memref<1x1x64xf32, #tpu.memory_space<vmem>>, %arg5: memref<1x64x128xbf16, #tpu.memory_space<vmem>>, %arg6: memref<1x1x128xf32, #tpu.memory_space<vmem>>, %arg7: memref<1x8x128xf32, #tpu.memory_space<vmem>>) attributes {dimension_semantics = [#tpu.dimension_semantics<parallel>, #tpu.dimension_semantics<parallel>], iteration_bounds = array<i64: 2, 1>, scalar_prefetch = 0 : i64, scratch_operands = 0 : i64, tpu.core_type = #tpu.core_type<tc>, window_params = [{transform_indices = @transform_0, window_bounds = array<i64: 1, 8, 32>}, {pipeline_mode = #tpu.pipeline_mode<synchronous>, transform_indices = @transform_1, window_bounds = array<i64: 1, 32, 64>}, {pipeline_mode = #tpu.pipeline_mode<synchronous>, transform_indices = @transform_2, window_bounds = array<i64: 1, 1, 64>}, {pipeline_mode = #tpu.pipeline_mode<synchronous>, transform_indices = @transform_3, window_bounds = array<i64: 1, 64, 128>}, {pipeline_mode = #tpu.pipeline_mode<synchronous>, transform_indices = @transform_4, window_bounds = array<i64: 1, 1, 128>}, {transform_indices = @transform_5, window_bounds = array<i64: 1, 8, 128>}]} {
    %c0 = arith.constant 0 : index
    %c0_0 = arith.constant 0 : index
    %c0_1 = arith.constant 0 : index
    %0 = vector.load %arg2[%c0, %c0_0, %c0_1] : memref<1x8x32xf32, #tpu.memory_space<vmem>>, vector<1x8x32xf32>
    %1 = vector.shape_cast %0 : vector<1x8x32xf32> to vector<8x32xf32>
    %2 = arith.truncf %1 : vector<8x32xf32> to vector<8x32xbf16>
    %c0_2 = arith.constant 0 : index
    %c0_3 = arith.constant 0 : index
    %c0_4 = arith.constant 0 : index
    %3 = vector.load %arg3[%c0_2, %c0_3, %c0_4] : memref<1x32x64xbf16, #tpu.memory_space<vmem>>, vector<1x32x64xbf16>
    %4 = vector.shape_cast %3 : vector<1x32x64xbf16> to vector<32x64xbf16>
    %cst = arith.constant dense<0.000000e+00> : vector<8x64xf32>
    %5 = tpu.matmul %2, %4, %cst {dimension_numbers = #tpu.dot_dimension_numbers<[1], [0], [0], [1], [0, 0, 1, 1], [], []>} : vector<8x32xbf16>, vector<32x64xbf16>, vector<8x64xf32> -> vector<8x64xf32>
    %c0_5 = arith.constant 0 : index
    %c0_6 = arith.constant 0 : index
    %c0_7 = arith.constant 0 : index
    %6 = vector.load %arg4[%c0_5, %c0_6, %c0_7] : memref<1x1x64xf32, #tpu.memory_space<vmem>>, vector<1x1x64xf32>
    %7 = vector.shape_cast %6 : vector<1x1x64xf32> to vector<1x64xf32>
    %8 = vector.broadcast %7 : vector<1x64xf32> to vector<8x64xf32>
    %9 = arith.addf %5, %8 : vector<8x64xf32>
    %cst_8 = arith.constant 0.000000e+00 : f32
    %10 = vector.broadcast %cst_8 : f32 to vector<8x64xf32>
    %11 = arith.maximumf %9, %10 : vector<8x64xf32>
    %12 = arith.truncf %11 : vector<8x64xf32> to vector<8x64xbf16>
    %c0_9 = arith.constant 0 : index
    %c0_10 = arith.constant 0 : index
    %c0_11 = arith.constant 0 : index
    %13 = vector.load %arg5[%c0_9, %c0_10, %c0_11] : memref<1x64x128xbf16, #tpu.memory_space<vmem>>, vector<1x64x128xbf16>
    %14 = vector.shape_cast %13 : vector<1x64x128xbf16> to vector<64x128xbf16>
    %cst_12 = arith.constant dense<0.000000e+00> : vector<8x128xf32>
    %15 = tpu.matmul %12, %14, %cst_12 {dimension_numbers = #tpu.dot_dimension_numbers<[1], [0], [0], [1], [0, 0, 1, 1], [], []>} : vector<8x64xbf16>, vector<64x128xbf16>, vector<8x128xf32> -> vector<8x128xf32>
    %c0_13 = arith.constant 0 : index
    %c0_14 = arith.constant 0 : index
    %c0_15 = arith.constant 0 : index
    %16 = vector.load %arg6[%c0_13, %c0_14, %c0_15] : memref<1x1x128xf32, #tpu.memory_space<vmem>>, vector<1x1x128xf32>
    %17 = vector.shape_cast %16 : vector<1x1x128xf32> to vector<1x128xf32>
    %18 = vector.broadcast %17 : vector<1x128xf32> to vector<8x128xf32>
    %19 = arith.addf %15, %18 : vector<8x128xf32>
    %c0_16 = arith.constant 0 : index
    %c0_17 = arith.constant 0 : index
    %c0_18 = arith.constant 0 : index
    %20 = vector.load %arg7[%c0_16, %c0_17, %c0_18] : memref<1x8x128xf32, #tpu.memory_space<vmem>>, vector<1x8x128xf32>
    %21 = vector.shape_cast %20 : vector<1x8x128xf32> to vector<8x128xf32>
    %22 = vector.shape_cast %19 : vector<8x128xf32> to vector<1x8x128xf32>
    tpu.vector_store %arg7[%c0_16, %c0_17, %c0_18], %22 {strides = array<i32>} : memref<1x8x128xf32, #tpu.memory_space<vmem>>, vector<1x8x128xf32>,
    return
  }
  func.func @transform_0(%arg0: i32, %arg1: i32) -> (i32, i32, i32) {
    %c0_i32 = arith.constant 0 : i32
    %c0_i32_0 = arith.constant 0 : i32
    return %arg0, %arg1, %c0_i32 : i32, i32, i32
  }
  func.func @transform_1(%arg0: i32, %arg1: i32) -> (i32, i32, i32) {
    %c0_i32 = arith.constant 0 : i32
    %c0_i32_0 = arith.constant 0 : i32
    %c0_i32_1 = arith.constant 0 : i32
    return %arg0, %c0_i32, %c0_i32_0 : i32, i32, i32
  }
  func.func @transform_2(%arg0: i32, %arg1: i32) -> (i32, i32, i32) {
    %c0_i32 = arith.constant 0 : i32
    %c0_i32_0 = arith.constant 0 : i32
    %c0_i32_1 = arith.constant 0 : i32
    return %arg0, %c0_i32, %c0_i32_0 : i32, i32, i32
  }
  func.func @transform_3(%arg0: i32, %arg1: i32) -> (i32, i32, i32) {
    %c0_i32 = arith.constant 0 : i32
    %c0_i32_0 = arith.constant 0 : i32
    %c0_i32_1 = arith.constant 0 : i32
    return %arg0, %c0_i32, %c0_i32_0 : i32, i32, i32
  }
  func.func @transform_4(%arg0: i32, %arg1: i32) -> (i32, i32, i32) {
    %c0_i32 = arith.constant 0 : i32
    %c0_i32_0 = arith.constant 0 : i32
    %c0_i32_1 = arith.constant 0 : i32
    return %arg0, %c0_i32, %c0_i32_0 : i32, i32, i32
  }
  func.func @transform_5(%arg0: i32, %arg1: i32) -> (i32, i32, i32) {
    %c0_i32 = arith.constant 0 : i32
    %c0_i32_0 = arith.constant 0 : i32
    return %arg0, %arg1, %c0_i32 : i32, i32, i32
  }
}

</mosaic_0001>

<bundles_post_ra>
// kernel: tpu_custom_call.1
= control target key start
LH: loop header
LB: loop body
LE: loop exit
PB: predicated region body
PF: predicated region fallthrough
CT: control target
= control target key end

     0   :  { %10 = vsyncpa [#allocation3], 0  ;;  %s1253_s0 = inlined_call_operand.hbm [shape: f32[2,8,32], index: 0, kind: input, shape index: {}]   ;;  %s1254_s1 = inlined_call_operand.hbm [shape: bf16[2,32,64], index: 1, kind: input, shape index: {}]   ;;  %s1255_s2 = inlined_call_operand.vmem [shape: f32[2,1,64], index: 2, kind: input, shape index: {}]   ;;  %s1256_s3 = inlined_call_operand.hbm [shape: bf16[2,64,128], index: 3, kind: input, shape index: {}]   ;;  %s1257_s4 = inlined_call_operand.vmem [shape: f32[2,1,128], index: 4, kind: input, shape index: {}]   ;;  %s1258_s5 = inlined_call_operand.hbm [shape: f32[2,8,128], index: 5, kind: output, shape index: {}]  }
   0x1   :  { %12 = vsyncpa [#allocation3 + $0x1], 0 }
   0x2   :  { %13 = vsyncpa [#allocation6], 0 }
   0x3   :  { %14 = vsyncpa [#allocation4], 0 }
   0x4   :  { %16 = vsyncpa [#allocation4 + $0x1], 0  ;;  %s986_s18 = smov 0   ;;  %s988_s19 = smov 0  }
   0x5   :  { %s990_s20 = smov 0   ;;  %s992_s21 = smov 0  }
   0x6   :  { %s994_s22 = smov 0   ;;  %s996_s23 = smov 0  }
   0x7 LB: > { %s628_s24 = sadd.s32 4294967295, %s946_s23   ;;  %s629_s25 = sadd.s32 4294967294, %s946_s23   ;;  %s946_s23 = sphi %s996_s23, %s22_s23   ;;  %s942_s22 = sphi %s994_s22, %s1277_s22   ;;  %s938_s21 = sphi %s992_s21, %s1276_s21   ;;  %s934_s20 = sphi %s990_s20, %s1275_s20   ;;  %s930_s19 = sphi %s988_s19, %s1274_s19   ;;  %s926_s18 = sphi %s986_s18, %s1273_s18  }
   0x8   : > { %p56_p0 = scmp.ne.s32.totalorder %s930_s19, %s926_s18  ;;  %p57_p1 = scmp.eq.s32.totalorder %s628_s24, 0 }
   0x9   : > { %p192_p2 = scmp.eq.s32.totalorder %s629_s25, 1  ;;  %p630_p3 = scmp.ge.s32.totalorder %s946_s23, 1 }
   0xa   : > { %p1023_p4 = por %p57_p1, %p56_p0  ;;  %p199_p5 = scmp.lt.s32.totalorder %s946_s23, 3 }
   0xb   : > { %p1028_p6 = por %p192_p2, %p56_p0  ;;  %s655_s28 = sshll.u32 %s938_s21, 8 }
   0xc   : > { %s1262_s26 = scalar_select %p1023_p4, 1, 0 }
   0xd   : > { %s1263_s27 = scalar_select %p1028_p6, 1, 0 }
   0xe   : > { %p1033_p7 = pnand %p630_p3, %p199_p5  ;;  %s1040_s7 = scalar_lea.hbm %s1254_s1, %s655_s28 }
   0xf   : > { %s948_s8 = smov [#allocation5]   ;;  %s656_s11 = sshll.u32 %s938_s21, 9 }
  0x10   : > { %s1264_s29 = scalar_select %p1033_p7, 1, 0 }
  0x11   : > { %p693_p8 = pneg %p1033_p7  ;;  %s214_s9 = sshll.u32 %s948_s8, 4  ;;  %s1044_s9 = int_to_ptr.vmem [resolvable:$true] %s214_s9 }
  0x12   : > { %s1056_s14 = scalar_lea.hbm %s1256_s3, %s656_s11  ;;  %s770_s15 = scalar_lea.hbm %s1040_s7, 256 }
  0x13   : > { %p1048_p9 = pnand %p693_p8, %p1023_p4  ;;  %p771_p11 = scmp.ne.s32.totalorder %s1040_s7, %s770_s15 }
  0x14   : > { %s775_s25 = scalar_lea.hbm %s1254_s1, 512  ;;  %p776_p1 = scmp.lt.u32.totalorder %s1040_s7, %s1254_s1 }
  0x15   : > { %p772_p12 = pneg %p1048_p9  ;;  %p777_p2 = scmp.lt.u32.totalorder %s775_s25, %s770_s15 }
  0x16   : > { %p779_p5 = scmp.lt.u32.totalorder %s770_s15, %s1040_s7 }
  0x17   : > { %p773_p13 = pnand %p772_p12, %p771_p11  ;;  %p778_p3 = por %p777_p2, %p776_p1 }
  0x19   : > { %p774_p0 = pneg %p773_p13  ;;  %p780_p8 = por %p779_p5, %p778_p3 }
  0x1b   : > { %p781_p10 = pnand %p780_p8, %p774_p0 }
  0x1d   : > { %784 = shalt.err (!%p781_p10)
}
  0x1e   : > { %s785_s6 = scalar_lea.vmem %s1044_s9, 256  ;;  %p793_p4 = scmp.lt.s32.totalorder %s1044_s9, %s1044_s9 }
  0x1f   : > { %p786_p11 = scmp.ne.s32.totalorder %s1044_s9, %s785_s6  ;;  %p794_p7 = scmp.lt.s32.totalorder %s785_s6, %s785_s6 }
  0x21   : > { %p788_p13 = pnand %p786_p11, %p772_p12  ;;  %p795_p1 = por %p794_p7, %p793_p4 }
  0x23   : > { %p789_p6 = pneg %p788_p13 }
  0x25   : > { %p796_p2 = pnand %p795_p1, %p789_p6 }
  0x27   : > { %799 = shalt.err (!%p796_p2)
}
  0x28   : > { %s949_s8 = smov 64   ;;  %s950_s11 = smov 4  }
  0x29   : > { %696 = dma.hbm_to_vmem [thread:$0]  (!%p1048_p9), %s1040_s7, 256, %s1044_s9, [#allocation6], %s949_s8, %s949_s8, %s950_s11  }
  0x2a   : > { %s951_s12 = smov [#allocation7]   ;;  %s800_s15 = scalar_lea.hbm %s1056_s14, 512 }
  0x2b   : > { %s236_s13 = sshll.u32 %s951_s12, 4  ;;  %p801_p4 = scmp.ne.s32.totalorder %s1056_s14, %s800_s15  ;;  %s237_s13 = int_to_ptr.vmem [resolvable:$true] %s236_s13 }
  0x2c   : > { %s805_s25 = scalar_lea.hbm %s1256_s3, 1024  ;;  %p806_p10 = scmp.lt.u32.totalorder %s1056_s14, %s1256_s3 }
  0x2d   : > { %p803_p6 = pnand %p801_p4, %p772_p12  ;;  %p807_p0 = scmp.lt.u32.totalorder %s805_s25, %s800_s15 }
  0x2e   : > { %p809_p5 = scmp.lt.u32.totalorder %s800_s15, %s1056_s14 }
  0x2f   : > { %p804_p7 = pneg %p803_p6  ;;  %p808_p3 = por %p807_p0, %p806_p10 }
  0x31   : > { %p810_p8 = por %p809_p5, %p808_p3 }
  0x33   : > { %p811_p11 = pnand %p810_p8, %p804_p7 }
  0x35   : > { %814 = shalt.err (!%p811_p11)
}
  0x36   : > { %s815_s7 = scalar_lea.vmem %s237_s13, 512  ;;  %p823_p4 = scmp.lt.s32.totalorder %s237_s13, %s237_s13 }
  0x37   : > { %p816_p13 = scmp.ne.s32.totalorder %s237_s13, %s815_s7  ;;  %p824_p6 = scmp.lt.s32.totalorder %s815_s7, %s815_s7 }
  0x39   : > { %p818_p1 = pnand %p816_p13, %p772_p12  ;;  %p825_p0 = por %p824_p6, %p823_p4 }
  0x3b   : > { %p819_p2 = pneg %p818_p1 }
  0x3d   : > { %p826_p10 = pnand %p825_p0, %p819_p2 }
  0x3f   : > { %829 = shalt.err (!%p826_p10)
}
  0x40   : > { %699 = dma.hbm_to_vmem [thread:$0]  (!%p1048_p9), %s1056_s14, 512, %s237_s13, [#allocation6], %s949_s8, %s949_s8, %s950_s11  }
  0x41   : > { %s34_s9 = sadd.s32 1, %s942_s22  ;;  %s43_s6 = sadd.s32 1, %s934_s20 }
  0x42   : > { %p36_p12 = scmp.ge.s32.totalorder %s34_s9, 2  ;;  %p50_p7 = scmp.ne.s32.totalorder %s934_s20, %s930_s19 }
  0x43   : > { %p51_p3 = scmp.eq.s32.totalorder %s946_s23, 0  ;;  %p186_p5 = scmp.eq.s32.totalorder %s628_s24, 1 }
  0x44   : > { %s1279_s9 = smov (%p36_p12, %s34_s9), 0  ;;  %p708_p9 = scmp.lt.s32.totalorder %s946_s23, 2 }
  0x45   : > { %p1119_p8 = por %p51_p3, %p50_p7  ;;  %p1123_p11 = por %p186_p5, %p50_p7 }
  0x46   : > { %s38_s14 = ssub.s32 %s942_s22, %s1279_s9  ;;  %s256_s8 = sand.u32 1, %s934_s20  }
  0x47   : > { %p41_p13 = scmp.eq.s32.totalorder %s38_s14, 0  ;;  %s636_s11 = sshll.u32 %s256_s8, 3 }
  0x48   : > { %s637_s24 = sshll.u32 %s942_s22, 7  ;;  %s260_s25 = scalar_lea.vmem [#allocation2], %s636_s11 }
  0x49   : > { %s1132_s13 = scalar_select %p41_p13, %s934_s20, %s43_s6  }
  0x4a   : > { %s1138_s17 = scalar_lea.hbm %s1253_s0, %s637_s24  ;;  %s268_s28 = sshll.u32 %s260_s25, 4  ;;  %s1140_s28 = int_to_ptr.vmem [resolvable:$true] %s268_s28 }
  0x4b   : > { %p1144_p1 = pnand %p708_p9, %p1119_p8  ;;  %s257_s7 = scalar_lea.sflag [#allocation3], %s256_s8 }
  0x4c   : > { %s830_s6 = scalar_lea.hbm %s1138_s17, 128  ;;  %s835_s24 = scalar_lea.hbm %s1253_s0, 256 }
  0x4d   : > { %p831_p2 = scmp.ne.s32.totalorder %s1138_s17, %s830_s6  ;;  %p832_p4 = pneg %p1144_p1 }
  0x4e   : > { %p836_p10 = scmp.lt.u32.totalorder %s1138_s17, %s1253_s0  ;;  %p837_p12 = scmp.lt.u32.totalorder %s835_s24, %s830_s6 }
  0x4f   : > { %p833_p6 = pnand %p832_p4, %p831_p2  ;;  %p839_p3 = scmp.lt.u32.totalorder %s830_s6, %s1138_s17 }
  0x50   : > { %p838_p7 = por %p837_p12, %p836_p10 }
  0x51   : > { %p834_p0 = pneg %p833_p6 }
  0x52   : > { %p840_p5 = por %p839_p3, %p838_p7 }
  0x54   : > { %p841_p8 = pnand %p840_p5, %p834_p0 }
  0x56   : > { %844 = shalt.err (!%p841_p8)
}
  0x57   : > { %s845_s8 = scalar_lea.vmem %s1140_s28, 128  ;;  %s952_s16 = smov [#allocation2]  }
  0x58   : > { %p846_p9 = scmp.ne.s32.totalorder %s1140_s28, %s845_s8  ;;  %s850_s25 = sshll.u32 %s952_s16, 4  ;;  %s851_s25 = int_to_ptr.vmem [resolvable:$false] %s850_s25 }
  0x59   : > { %s852_s14 = scalar_lea.vmem %s851_s25, 256  ;;  %p853_p6 = scmp.lt.s32.totalorder %s1140_s28, %s851_s25 }
  0x5a   : > { %p848_p13 = pnand %p846_p9, %p832_p4  ;;  %p854_p10 = scmp.lt.s32.totalorder %s852_s14, %s845_s8 }
  0x5c   : > { %p849_p2 = pneg %p848_p13  ;;  %p855_p12 = por %p854_p10, %p853_p6 }
  0x5e   : > { %p856_p7 = pnand %p855_p12, %p849_p2 }
  0x60   : > { %859 = shalt.err (!%p856_p7)
}
  0x61   : > { %703 = dma.hbm_to_vmem [thread:$0]  (!%p1144_p1), %s1138_s17, 128, %s1140_s28, %s257_s7  }
  0x62   : > { %p1269_p0 = scmp.ne.s32.totalorder %s1264_s29, 0 }
  0x63   : > { %s1176_s6 = sand.u32 (!%p1269_p0), 1, %s930_s19   ;;  %p1270_p4 = scmp.ne.s32.totalorder (!%p1269_p0), %s1262_s26, 0 }
  0x64   : > { %277 = sbr.rel (%p1269_p0) target bundleno = 566 (0x236), region = 40  ;;  %s639_s11 = sshll.u32 (!%p1269_p0), %s1176_s6, 3 }
  0x65   : > { %s280_s24 = scalar_lea.sflag (!%p1269_p0), [#allocation3], %s1176_s6  ;;  %s283_s10 = scalar_lea.vmem (!%p1269_p0), [#allocation2], %s639_s11 }
  0x6b   : > { %913 = dma.done.wait (%p1270_p4), %s280_s24, 128  }
  0x6c   : > { %915 = vsyncadd (%p1270_p4), %s280_s24, 4294967168 }
  0x6d   : > { %917 = dma.done.wait (%p1270_p4), [#allocation6], 768  }
  0x6e   : > { %919 = vsyncadd (%p1270_p4), [#allocation6], 4294966528  ;;  %v953_v0 = vmov 0.0   ;;  %vm954_vm0 = vmmov 0   ;;  %v764_v1 = vld [vmem:[#allocation5] sm:$0xff]   ;;  %v765_v2 = vld [vmem:[#allocation5 + $0x8] sm:$0xff]  }
  0x6f   : > { %665 = vmatprep.subr.bf16.mxu0 %v953_v0  ;;  %669 = vmatprep.mubr.msk.bf16.mxu0 %vm954_vm0, %v953_v0  ;;  %v331_v3 = vld [vmem:[%s283_s10] sm:$0xff]  ;;  %vm356_vm1 = vcmask 261120   ;;  %v768_v7 = vld [vmem:[#allocation7 + $0x10] sm:$0xff]   ;;  %v769_v8 = vld [vmem:[#allocation7 + $0x18] sm:$0xff]   ;;  %p324_p1 = scmp.lt.s32.totalorder %s938_s21, 1  ;;  %vm441_vm2 = vcmask 523264  }
  0x70   : > { %673 = vmatprep.subr.bf16.mxu1 %v953_v0  ;;  %681 = vmatprep.mubr.msk.bf16.mxu1 %vm954_vm0, %v953_v0  ;;  %v766_v4 = vld [vmem:[#allocation7] sm:$0xff]   ;;  %v767_v5 = vld [vmem:[#allocation7 + $0x8] sm:$0xff]   ;;  %v332_v6 = vpack.c.bf16 %v331_v3, %v331_v3  ;;  %s652_s8 = sshll.u32 %s938_s21, 7  ;;  %s323_s16 = scalar_lea.vmem [#allocation8], %s639_s11 }
  0x71   : > { %666 = vmatpush3.bf16.msra.mxu0 %v764_v1  ;;  %674 = vmatpush3.bf16.msra.mxu1 %v766_v4  ;;  %s325_s26 = scalar_select %p324_p1, %s938_s21, 1 }
  0x72   : > { %667 = vmatprep.subr.bf16.mxu0 %v953_v0  ;;  %675 = vmatprep.subr.bf16.mxu1 %v953_v0  ;;  %s501_s25 = sshll.u32 %s323_s16, 4  ;;  %s1204_s10 = scalar_lea.hbm %s1258_s5, %s652_s8  ;;  %s1206_s25 = int_to_ptr.vmem [resolvable:$true] %s501_s25 }
  0x73   : > { %s326_s28 = scalar_lea.vmem %s1255_s2, %s325_s26  ;;  %s329_s15 = scalar_lea.vmem %s1257_s4, %s325_s26 }
  0x74   : > { %v641_v9 = vld [vmem:[%s326_s28] ss:$0 sm:$0xff]  ;;  %s487_s21 = scalar_lea.sflag [#allocation4], %s1176_s6  ;;  %s860_s26 = scalar_lea.vmem %s1206_s25, 128 }
  0x75   : > { %668 = vmatpush3.bf16.msra.mxu0 %v765_v2  ;;  %676 = vmatpush3.bf16.msra.mxu1 %v767_v5  ;;  %v645_v17 = vld [vmem:[%s329_s15] ss:$0 sm:$0xff]  ;;  %p861_p3 = scmp.ne.s32.totalorder %s1206_s25, %s860_s26  ;;  %s955_s11 = smov [#allocation8]  }
  0x76   : > { %677 = vmatprep.subr.bf16.mxu1 %v953_v0  ;;  %s864_s29 = sshll.u32 %s955_s11, 4  ;;  %s865_s29 = int_to_ptr.vmem [resolvable:$false] %s864_s29 }
  0x77   : > { %p862_p5 = pnand %p861_p3, %p1123_p11  ;;  %s866_s17 = scalar_lea.vmem %s865_s29, 256 }
  0x78   : > { %670 = vmatmul.mubr.msk.bf16.vlgmr.msra.gmra.mrb[0].mxu0 %vm356_vm1, %v332_v6  ;;  %p867_p9 = scmp.lt.s32.totalorder %s1206_s25, %s865_s29  ;;  %p868_p13 = scmp.lt.s32.totalorder %s866_s17, %s860_s26 }
  0x79   : > { %678 = vmatpush3.bf16.msra.mxu1 %v768_v7  ;;  %p863_p8 = pneg %p862_p5 }
  0x7a   : > { %679 = vmatprep.subr.bf16.mxu1 %v953_v0  ;;  %p869_p2 = por %p868_p13, %p867_p9 }
  0x7c   : > { %p870_p6 = pnand %p869_p2, %p863_p8 }
  0x7d   : > { %680 = vmatpush3.bf16.msra.mxu1 %v769_v8 }
 0x14b   : > { %v394_v10 = vpop.f32.mrb[0].mxu0 }
 0x14c   : > { %v395_v11 = vadd.f32 %v641_v9, %v394_v10  ;;  %v671_v12 = vpop.f32.mrb[1].mxu0 }
 0x14d   : > { %v397_v13 = vpop.f32.mrb[2].mxu0 }
 0x14e   : > { %v400_v14 = vmax.f32 %v395_v11, 0.0  ;;  %v672_v15 = vpop.f32.mrb[3].mxu0 }
 0x150   : > { %v401_v16 = vpack.c.bf16 %v400_v14, %v400_v14 }
 0x152   : > { %682 = vmatmul.mubr.msk.bf16.vlgmr.msra.gmra.mrb[0].mxu1 %vm441_vm2, %v401_v16 }
 0x225   : > { %v479_v18 = vpop.f32.mrb[0].mxu1 }
 0x226   : > { %v480_v19 = vadd.f32 %v645_v17, %v479_v18  ;;  %v683_v20 = vpop.f32.mrb[1].mxu1 }
 0x227   : > { %v482_v21 = vpop.f32.mrb[2].mxu1 }
 0x228   : > { %485 = vst [vmem:[%s323_s16] sm:$0xff] %v480_v19  ;;  %v684_v22 = vpop.f32.mrb[3].mxu1 }
 0x229   : > { %873 = shalt.err (!%p870_p6)
}
 0x22a   : > { %s874_s6 = scalar_lea.hbm %s1204_s10, 128  ;;  %s878_s7 = scalar_lea.hbm %s1258_s5, 256 }
 0x22b   : > { %p875_p10 = scmp.ne.s32.totalorder %s1204_s10, %s874_s6  ;;  %p879_p0 = scmp.lt.u32.totalorder %s1204_s10, %s1258_s5 }
 0x22c   : > { %p880_p4 = scmp.lt.u32.totalorder %s878_s7, %s874_s6  ;;  %p882_p3 = scmp.lt.u32.totalorder %s874_s6, %s1204_s10 }
 0x22d   : > { %p876_p12 = pnand %p875_p10, %p1123_p11 }
 0x22e   : > { %p881_p1 = por %p880_p4, %p879_p0 }
 0x22f   : > { %p877_p7 = pneg %p876_p12 }
 0x230   : > { %p883_p5 = por %p882_p3, %p881_p1 }
 0x232   : > { %p884_p8 = pnand %p883_p5, %p877_p7 }
 0x234   : > { %887 = shalt.err (!%p884_p8)
}
 0x235   : > { %691 = dma.vmem_to_hbm [thread:$0]  (%p1123_p11), %s1206_s25, 128, %s1204_s10, %s487_s21  }
 0x236 PF: > { %s513_s16 = sand.u32 1, %s926_s18   ;;  %p1271_p9 = scmp.ne.s32.totalorder %s1263_s27, 0 }
 0x237   : > { %p1272_p13 = scmp.ge.s32.totalorder %s946_s23, 2  ;;  %s514_s14 = scalar_lea.sflag [#allocation4], %s513_s16 }
 0x239   : > { %p705_p2 = pnand %p1272_p13, %p1271_p9 }
 0x23b   : > { %921 = dma.done.wait (!%p705_p2), %s514_s14, 128  }
 0x23c   : > { %923 = vsyncadd (!%p705_p2), %s514_s14, 4294967168  ;;  %s22_s23 = sadd.s32 1, %s946_s23   ;;  %s1273_s18 = smov %s930_s19 }
 0x23d   : > { %p19_p6 = scmp.ge.s32.totalorder %s22_s23, 4   ;;  %s1274_s19 = smov %s934_s20 }
 0x23e   : > { %s1275_s20 = smov %s1132_s13  ;;  %s1276_s21 = smov %s942_s22 }
 0x23f   : > { %s1277_s22 = smov %s1279_s9  ;;  %21 = sbr.rel (!%p19_p6) target bundleno = 7 (0x7), region = 101 }
 0x246   :  { %519 = vsyncpa [#allocation3], 1 }
 0x247   :  { %521 = vsyncpa [#allocation3 + $0x1], 1 }
 0x248   :  { %522 = vsyncpa [#allocation6], 1 }
 0x249   :  { %523 = vsyncpa [#allocation4], 1 }
 0x24a   :  { %525 = vsyncpa [#allocation4 + $0x1], 1 }

</bundles_post_ra>
